<compile_context>
chip_gen: v5e
topology: v5e:2x2
jax: 0.10.0
libtpu: 0.0.40
codegen_flags: <defaults>
</compile_context>

<pallas_src>
import jax
import jax.numpy as jnp
import numpy as np
from jax.experimental import pallas as pl
from jax.experimental.pallas import tpu as pltpu

# ---------------- model configuration (small, synthetic) ----------------
B = 8          # batch
L = 8          # user-behavior sequence length
E = 16         # input_emb_size (raw item embedding dim)
D = 8          # item_dim (after item_layer)
H1_ATT = 64    # LocalActivationUnit hidden_unit[0]
H2_ATT = 16    # LocalActivationUnit hidden_unit[1]
HID_FC = 32    # fc_layer hid_units[0]  (hid_units = [32, 1])
VOCAB = 32
PAD_IDX = 0
DICE_EPS = 1e-9

BL = B * L


def _r8(n):
    return ((n + 7) // 8) * 8


# ---- packed per-batch input slab layout: (X_ROWS, X_LANES) bf16 ----
X_RE = 0                     # history embeddings,      rows [0, BL),        lanes [0, E)
X_RQ = BL                    # replicated query emb,    rows [BL, 2BL),      lanes [0, E)
X_RI = 2 * BL                # target item emb,         rows [2BL, 2BL+B),   lanes [0, E)
X_RP = _r8(2 * BL + B)       # masked pooling matrix,   rows [X_RP, X_RP+B), lanes [0, BL)
X_ROWS = _r8(X_RP + B)
X_LANES = max(E, BL)

# ---- packed weight slab layout: (W_ROWS, 128) bf16 ----
W_WI = 0                     # item_layer weight (E, D)
W_BI = E                     # item_layer bias (1, D)
W_SC = E + 1                 # scalar row: [b23, bf2, 0, ...]
W_A1 = _r8(E + 2)            # fused fc1 weight (3D, H1) = [w1u-w1d ; w1p ; w1q+w1d]
W_P1 = W_A1 + 3 * D          # 6 rows: b1, alpha1, 1-alpha1, gamma1', beta1, w2@w3
W_AF = _r8(W_P1 + 6)         # final-MLP weight (2D, HID) = wf1
W_PF = W_AF + 2 * D          # 6 rows: bf1, alphaf, 1-alphaf, gammaf', betaf, wf2
W_ROWS = _r8(W_PF + 6)
W_LANES = 128


# ------------------------------ Dice ------------------------------
def _dice_ref(x, alpha, gamma, beta):
    # Dice activation, BatchNorm1d in eval mode with running stats (0, 1).
    x_norm = x * (gamma / jnp.sqrt(1.0 + DICE_EPS)) + beta
    p = jax.nn.sigmoid(x_norm)
    return alpha * (1.0 - p) * x + p * x


def _dice_folded(x, alpha, one_minus_alpha, gamma_scaled, beta):
    # Host-folded form: dice(x) = x * (alpha + (1-alpha) * sigmoid(x*gamma' + beta)),
    # with gamma' = gamma / sqrt(1 + eps) baked into the packed slab.
    p = jax.nn.sigmoid(x * gamma_scaled + beta)
    return x * (alpha + one_minus_alpha * p)


# ----------------------------- Pallas kernel -----------------------------
def din_kernel(x_ref, w_ref, out_ref):
    f32 = jnp.float32
    bf16 = jnp.bfloat16

    # ---- per-batch data (one bf16 slab) ----
    x_emb = x_ref[0:X_RI + B, 0:E]            # (2BL+B, E) history | replicated-q | target
    pmat = x_ref[X_RP:X_RP + B, 0:BL]         # (B, BL)    mask-folded pooling matrix

    # ---- weights (one bf16 slab; static slices are views) ----
    w_item = w_ref[W_WI:W_WI + E, 0:D]
    b_item = w_ref[W_BI:W_BI + 1, 0:D]
    scal = w_ref[W_SC:W_SC + 1, 0:D]
    b23 = scal[:, 0:1]
    bf2 = scal[:, 1:2]

    w1_cat = w_ref[W_A1:W_A1 + 3 * D, 0:H1_ATT]
    b1 = w_ref[W_P1 + 0:W_P1 + 1, 0:H1_ATT]
    a1 = w_ref[W_P1 + 1:W_P1 + 2, 0:H1_ATT]
    oma1 = w_ref[W_P1 + 2:W_P1 + 3, 0:H1_ATT]
    g1 = w_ref[W_P1 + 3:W_P1 + 4, 0:H1_ATT]
    be1 = w_ref[W_P1 + 4:W_P1 + 5, 0:H1_ATT]
    w23 = w_ref[W_P1 + 5:W_P1 + 6, 0:H1_ATT]

    wf_cat = w_ref[W_AF:W_AF + 2 * D, 0:HID_FC]
    bf1 = w_ref[W_PF + 0:W_PF + 1, 0:HID_FC]
    af = w_ref[W_PF + 1:W_PF + 2, 0:HID_FC]
    omaf = w_ref[W_PF + 2:W_PF + 3, 0:HID_FC]
    gf = w_ref[W_PF + 3:W_PF + 4, 0:HID_FC]
    bef = w_ref[W_PF + 4:W_PF + 5, 0:HID_FC]
    wf2 = w_ref[W_PF + 5:W_PF + 6, 0:HID_FC]

    # ---- item_layer over history + replicated-query + target rows (one bf16 dot) ----
    emb = jnp.dot(x_emb, w_item, preferred_element_type=f32) + b_item     # (2BL+B, D) f32
    his = emb[X_RE:X_RE + BL]            # (BL, D) user behavior after item_layer
    q_rep = emb[X_RQ:X_RQ + BL]          # (BL, D) target emb replicated per position
    item = emb[X_RI:X_RI + B]            # (B, D)  target emb

    # ---- LocalActivationUnit fc1: folded cat([q,u,q-u,q*u]) -> one (BL,3D)x(3D,H1) dot ----
    hq = jnp.concatenate([his, his * q_rep, q_rep], axis=-1).astype(bf16)  # (BL, 3D)
    h1 = jnp.dot(hq, w1_cat, preferred_element_type=f32) + b1              # (BL, H1)
    h1 = _dice_folded(h1, a1, oma1, g1, be1)

    # ---- folded fc2+fc3 head: score = h1 @ (w2@w3) + b23  (VPU mul + lane reduce) ----
    score = jnp.sum(h1 * w23, axis=-1, keepdims=True) + b23                # (BL, 1) f32

    # ---- masked attention pooling as one matmul: pooled = P @ (score * his) ----
    weighted = (his * score).astype(bf16)                                  # (BL, D)
    pooled = jnp.dot(pmat, weighted, preferred_element_type=f32)           # (B, D)

    # ---- final MLP: one (B,2D)x(2D,HID) dot -> Dice -> N=1 head -> sigmoid ----
    fin = jnp.concatenate([item, pooled], axis=-1).astype(bf16)            # (B, 2D)
    f1 = jnp.dot(fin, wf_cat, preferred_element_type=f32) + bf1            # (B, HID)
    f1 = _dice_folded(f1, af, omaf, gf, bef)
    logits = jnp.sum(f1 * wf2, axis=-1, keepdims=True) + bf2               # (B, 1)
    out_ref[...] = jax.nn.sigmoid(logits).reshape(1, B)                    # lane-dense (1, B)


# ------------------------- host-side packing ------------------------
def pack_weights(P):
    """Fold the exact algebra and pack every parameter into one bf16 slab."""
    inv = 1.0 / np.sqrt(1.0 + DICE_EPS)
    w1q_f = P["w1q"] + P["w1d"]                       # q absorbs the (q-u) block
    w1u_f = P["w1u"] - P["w1d"]                       # u loses it
    w1_cat = jnp.concatenate([w1u_f, P["w1p"], w1q_f], axis=0)     # (3D, H1)
    w23 = (P["w2"] @ P["w3"]).T                                    # (1, H1)
    b23 = (P["b2"] @ P["w3"] + P["b3"])[0, 0]
    bf2 = P["bf2"][0, 0]

    W = jnp.zeros((W_ROWS, W_LANES), jnp.float32)
    W = W.at[W_WI:W_WI + E, 0:D].set(P["w_item"])
    W = W.at[W_BI:W_BI + 1, 0:D].set(P["b_item"])
    W = W.at[W_SC, 0].set(b23)
    W = W.at[W_SC, 1].set(bf2)
    W = W.at[W_A1:W_A1 + 3 * D, 0:H1_ATT].set(w1_cat)
    W = W.at[W_P1 + 0, 0:H1_ATT].set(P["b1"][0])
    W = W.at[W_P1 + 1, 0:H1_ATT].set(P["a1"][0])
    W = W.at[W_P1 + 2, 0:H1_ATT].set(1.0 - P["a1"][0])
    W = W.at[W_P1 + 3, 0:H1_ATT].set(P["g1"][0] * inv)
    W = W.at[W_P1 + 4, 0:H1_ATT].set(P["be1"][0])
    W = W.at[W_P1 + 5, 0:H1_ATT].set(w23[0])
    W = W.at[W_AF:W_AF + 2 * D, 0:HID_FC].set(P["wf1"])
    W = W.at[W_PF + 0, 0:HID_FC].set(P["bf1"][0])
    W = W.at[W_PF + 1, 0:HID_FC].set(P["af"][0])
    W = W.at[W_PF + 2, 0:HID_FC].set(1.0 - P["af"][0])
    W = W.at[W_PF + 3, 0:HID_FC].set(P["gf"][0] * inv)
    W = W.at[W_PF + 4, 0:HID_FC].set(P["bef"][0])
    W = W.at[W_PF + 5, 0:HID_FC].set(P["wf2"].T[0])
    return W.astype(jnp.bfloat16)


def pack_inputs(rec_emb, item_emb_raw, keep):
    """Pack history / replicated-query / target embeddings + the mask-folded
    block-diagonal pooling matrix into one bf16 slab (single input DMA)."""
    Bsz, Lsz, Esz = rec_emb.shape
    nbl = Bsz * Lsz
    rec_flat = rec_emb.reshape(nbl, Esz)
    q_rep = jnp.repeat(item_emb_raw, Lsz, axis=0)                          # (BL, E)
    # pmat[b, b*L + l] = keep[b, l]  (0 at padding positions, block-diagonal)
    pmat = (jnp.eye(Bsz, dtype=jnp.float32)[:, :, None]
            * keep[None, :, :]).reshape(Bsz, nbl)
    x = jnp.zeros((X_ROWS, X_LANES), jnp.float32)
    x = x.at[X_RE:X_RE + nbl, 0:Esz].set(rec_flat)
    x = x.at[X_RQ:X_RQ + nbl, 0:Esz].set(q_rep)
    x = x.at[X_RI:X_RI + Bsz, 0:Esz].set(item_emb_raw)
    x = x.at[X_RP:X_RP + Bsz, 0:nbl].set(pmat)
    return x.astype(jnp.bfloat16)


# ------------------------------- wrapper ---------------------------------
def din_predict_pallas(rec_emb, item_emb_raw, keep, w_slab):
    """rec_emb: (B,L,E) f32, item_emb_raw: (B,E) f32, keep: (B,L) f32 (1.0 = real item)."""
    Bsz = rec_emb.shape[0]
    x_in = pack_inputs(rec_emb, item_emb_raw, keep)
    probs2d = pl.pallas_call(
        din_kernel,
        out_shape=jax.ShapeDtypeStruct((1, Bsz), jnp.float32),
        grid=(1,),
        in_specs=[
            pl.BlockSpec((X_ROWS, X_LANES), lambda i: (0, 0)),   # packed per-batch slab
            pl.BlockSpec((W_ROWS, W_LANES), lambda i: (0, 0)),   # packed weight slab
        ],
        out_specs=pl.BlockSpec((1, Bsz), lambda i: (0, 0)),
        compiler_params=pltpu.CompilerParams(dimension_semantics=("arbitrary",)),
    )(x_in, w_slab)
    return probs2d[0]


def din_forward_pallas(item_emb_matrix, rec_logs, items, labels, params):
    # Embedding gather + BCE-mean are trivial glue kept in plain JAX.
    rec_emb = item_emb_matrix[rec_logs]                      # (B, L, E)
    item_emb_raw = item_emb_matrix[items]                    # (B, E)
    keep = (rec_logs != PAD_IDX).astype(jnp.float32)         # (B, L), 1.0 = not padding
    w_slab = pack_weights(params)
    probs = din_predict_pallas(rec_emb, item_emb_raw, keep, w_slab)
    eps = 1e-7
    p = jnp.clip(probs, eps, 1.0 - eps)
    loss = -jnp.mean(labels * jnp.log(p) + (1.0 - labels) * jnp.log(1.0 - p))
    return loss, probs


# ------------------------- pure-JAX reference -----------------------------
def din_predict_ref(item_emb_matrix, rec_logs, items, P):
    rec_emb = item_emb_matrix[rec_logs]
    item_emb_raw = item_emb_matrix[items]
    mask = rec_logs == PAD_IDX

    his = rec_emb @ P["w_item"] + P["b_item"]                # (B, L, D)
    item = item_emb_raw @ P["w_item"] + P["b_item"]          # (B, D)
    q = jnp.broadcast_to(item[:, None, :], his.shape)
    attn_in = jnp.concatenate([q, his, q - his, q * his], axis=-1)
    h1 = _dice_ref(attn_in @ P["w1"] + P["b1"], P["a1"], P["g1"], P["be1"])
    h2 = h1 @ P["w2"] + P["b2"]
    score = h2 @ P["w3"] + P["b3"]                           # (B, L, 1)
    score = jnp.transpose(score, (0, 2, 1))                  # (B, 1, L)
    score = jnp.where(mask[:, None, :], 0.0, score)
    pooled = jnp.matmul(score, his)[:, 0, :]                 # (B, D)
    concat = jnp.concatenate([item, pooled], axis=-1)
    f1 = _dice_ref(concat @ P["wf1"] + P["bf1"], P["af"], P["gf"], P["bef"])
    logits = f1 @ P["wf2"] + P["bf2"]
    return jax.nn.sigmoid(logits)[:, 0]


# ------------------------- deterministic params ----------------------------
def make_params(key):
    ks = jax.random.split(key, 8)
    w_item = jax.random.normal(ks[0], (E, D), jnp.float32) * 0.2
    b_item = jax.random.normal(ks[1], (1, D), jnp.float32) * 0.05
    w1 = jax.random.normal(ks[2], (4 * D, H1_ATT), jnp.float32) * 0.2
    b1 = jnp.zeros((1, H1_ATT), jnp.float32)
    w2 = jax.random.normal(ks[3], (H1_ATT, H2_ATT), jnp.float32) * 0.2
    b2 = jnp.zeros((1, H2_ATT), jnp.float32)
    w3 = jax.random.normal(ks[4], (H2_ATT, 1), jnp.float32) * 0.2
    b3 = jnp.zeros((1, 1), jnp.float32)
    wf1 = jax.random.normal(ks[5], (2 * D, HID_FC), jnp.float32) * 0.2
    bf1 = jnp.zeros((1, HID_FC), jnp.float32)
    wf2 = jax.random.normal(ks[6], (HID_FC, 1), jnp.float32) * 0.2
    bf2 = jnp.zeros((1, 1), jnp.float32)
    return dict(
        w_item=w_item, b_item=b_item,
        w1=w1, b1=b1,
        w1q=w1[0 * D:1 * D], w1u=w1[1 * D:2 * D], w1d=w1[2 * D:3 * D], w1p=w1[3 * D:4 * D],
        a1=jnp.zeros((1, H1_ATT), jnp.float32),   # Dice alpha (zeros at init)
        g1=jnp.ones((1, H1_ATT), jnp.float32),    # BN gamma
        be1=jnp.zeros((1, H1_ATT), jnp.float32),  # BN beta
        w2=w2, b2=b2, w3=w3, b3=b3,
        wf1=wf1, bf1=bf1,
        af=jnp.zeros((1, HID_FC), jnp.float32),
        gf=jnp.ones((1, HID_FC), jnp.float32),
        bef=jnp.zeros((1, HID_FC), jnp.float32),
        wf2=wf2, bf2=bf2,
    )


if __name__ == "__main__":
    key = jax.random.PRNGKey(0)
    k_emb, k_logs, k_items, k_lab, k_par = jax.random.split(key, 5)

    item_emb_matrix = jax.random.normal(k_emb, (VOCAB, E), jnp.float32) * 0.5
    rec_logs = jax.random.randint(k_logs, (B, L), 0, VOCAB, dtype=jnp.int32)
    # force some padding positions so the mask path is exercised
    rec_logs = rec_logs.at[:, -2:].set(PAD_IDX)
    items = jax.random.randint(k_items, (B,), 1, VOCAB, dtype=jnp.int32)
    labels = jax.random.bernoulli(k_lab, 0.5, (B,)).astype(jnp.float32)

    P = make_params(k_par)

    loss, probs = din_forward_pallas(item_emb_matrix, rec_logs, items, labels, P)
    loss = jax.block_until_ready(loss)
    probs = jax.block_until_ready(probs)

    ref = din_predict_ref(item_emb_matrix, rec_logs, items, P)
    np.testing.assert_allclose(np.asarray(probs), np.asarray(ref), rtol=1e-2, atol=1e-2)
    assert np.isfinite(float(loss))

    print("KERNEL_OK")
</pallas_src>

<mosaic_0001>
module attributes {stable_mosaic.version = 11 : i64} {
  func.func @din_kernel(%arg0: i32, %arg1: memref<144x64xbf16, #tpu.memory_space<vmem>>, %arg2: memref<80x128xbf16, #tpu.memory_space<vmem>>, %arg3: memref<1x8xf32, #tpu.memory_space<vmem>>) attributes {dimension_semantics = [#tpu.dimension_semantics<arbitrary>], iteration_bounds = array<i64: 1>, scalar_prefetch = 0 : i64, scratch_operands = 0 : i64, tpu.core_type = #tpu.core_type<tc>, window_params = [{pipeline_mode = #tpu.pipeline_mode<synchronous>, transform_indices = @transform_0, window_bounds = array<i64: 144, 64>}, {pipeline_mode = #tpu.pipeline_mode<synchronous>, transform_indices = @transform_1, window_bounds = array<i64: 80, 128>}, {pipeline_mode = #tpu.pipeline_mode<synchronous>, transform_indices = @transform_2, window_bounds = array<i64: 1, 8>}]} {
    %c0 = arith.constant 0 : index
    %c0_0 = arith.constant 0 : index
    %0 = vector.load %arg1[%c0, %c0_0] : memref<144x64xbf16, #tpu.memory_space<vmem>>, vector<136x16xbf16>
    %c136 = arith.constant 136 : index
    %c0_1 = arith.constant 0 : index
    %1 = vector.load %arg1[%c136, %c0_1] : memref<144x64xbf16, #tpu.memory_space<vmem>>, vector<8x64xbf16>
    %c0_2 = arith.constant 0 : index
    %c0_3 = arith.constant 0 : index
    %2 = vector.load %arg2[%c0_2, %c0_3] : memref<80x128xbf16, #tpu.memory_space<vmem>>, vector<16x8xbf16>
    %c16 = arith.constant 16 : index
    %c0_4 = arith.constant 0 : index
    %3 = vector.load %arg2[%c16, %c0_4] : memref<80x128xbf16, #tpu.memory_space<vmem>>, vector<1x8xbf16>
    %c17 = arith.constant 17 : index
    %c0_5 = arith.constant 0 : index
    %4 = vector.load %arg2[%c17, %c0_5] : memref<80x128xbf16, #tpu.memory_space<vmem>>, vector<1x8xbf16>
    %5 = vector.extract_strided_slice %4 {offsets = [0, 0], sizes = [1, 1], strides = [1, 1]} : vector<1x8xbf16> to vector<1x1xbf16>
    %6 = vector.extract_strided_slice %4 {offsets = [0, 1], sizes = [1, 1], strides = [1, 1]} : vector<1x8xbf16> to vector<1x1xbf16>
    %c24 = arith.constant 24 : index
    %c0_6 = arith.constant 0 : index
    %7 = vector.load %arg2[%c24, %c0_6] : memref<80x128xbf16, #tpu.memory_space<vmem>>, vector<24x64xbf16>
    %c48 = arith.constant 48 : index
    %c0_7 = arith.constant 0 : index
    %8 = vector.load %arg2[%c48, %c0_7] : memref<80x128xbf16, #tpu.memory_space<vmem>>, vector<1x64xbf16>
    %c49 = arith.constant 49 : index
    %c0_8 = arith.constant 0 : index
    %9 = vector.load %arg2[%c49, %c0_8] : memref<80x128xbf16, #tpu.memory_space<vmem>>, vector<1x64xbf16>
    %c50 = arith.constant 50 : index
    %c0_9 = arith.constant 0 : index
    %10 = vector.load %arg2[%c50, %c0_9] : memref<80x128xbf16, #tpu.memory_space<vmem>>, vector<1x64xbf16>
    %c51 = arith.constant 51 : index
    %c0_10 = arith.constant 0 : index
    %11 = vector.load %arg2[%c51, %c0_10] : memref<80x128xbf16, #tpu.memory_space<vmem>>, vector<1x64xbf16>
    %c52 = arith.constant 52 : index
    %c0_11 = arith.constant 0 : index
    %12 = vector.load %arg2[%c52, %c0_11] : memref<80x128xbf16, #tpu.memory_space<vmem>>, vector<1x64xbf16>
    %c53 = arith.constant 53 : index
    %c0_12 = arith.constant 0 : index
    %13 = vector.load %arg2[%c53, %c0_12] : memref<80x128xbf16, #tpu.memory_space<vmem>>, vector<1x64xbf16>
    %c56 = arith.constant 56 : index
    %c0_13 = arith.constant 0 : index
    %14 = vector.load %arg2[%c56, %c0_13] : memref<80x128xbf16, #tpu.memory_space<vmem>>, vector<16x32xbf16>
    %c72 = arith.constant 72 : index
    %c0_14 = arith.constant 0 : index
    %15 = vector.load %arg2[%c72, %c0_14] : memref<80x128xbf16, #tpu.memory_space<vmem>>, vector<1x32xbf16>
    %c73 = arith.constant 73 : index
    %c0_15 = arith.constant 0 : index
    %16 = vector.load %arg2[%c73, %c0_15] : memref<80x128xbf16, #tpu.memory_space<vmem>>, vector<1x32xbf16>
    %c74 = arith.constant 74 : index
    %c0_16 = arith.constant 0 : index
    %17 = vector.load %arg2[%c74, %c0_16] : memref<80x128xbf16, #tpu.memory_space<vmem>>, vector<1x32xbf16>
    %c75 = arith.constant 75 : index
    %c0_17 = arith.constant 0 : index
    %18 = vector.load %arg2[%c75, %c0_17] : memref<80x128xbf16, #tpu.memory_space<vmem>>, vector<1x32xbf16>
    %c76 = arith.constant 76 : index
    %c0_18 = arith.constant 0 : index
    %19 = vector.load %arg2[%c76, %c0_18] : memref<80x128xbf16, #tpu.memory_space<vmem>>, vector<1x32xbf16>
    %c77 = arith.constant 77 : index
    %c0_19 = arith.constant 0 : index
    %20 = vector.load %arg2[%c77, %c0_19] : memref<80x128xbf16, #tpu.memory_space<vmem>>, vector<1x32xbf16>
    %cst = arith.constant dense<0.000000e+00> : vector<136x8xf32>
    %21 = tpu.matmul %0, %2, %cst {dimension_numbers = #tpu.dot_dimension_numbers<[1], [0], [0], [1], [0, 0, 1, 1], [], []>} : vector<136x16xbf16>, vector<16x8xbf16>, vector<136x8xf32> -> vector<136x8xf32>
    %22 = arith.extf %3 : vector<1x8xbf16> to vector<1x8xf32>
    %23 = vector.broadcast %22 : vector<1x8xf32> to vector<136x8xf32>
    %24 = arith.addf %21, %23 : vector<136x8xf32>
    %25 = vector.extract_strided_slice %24 {offsets = [0, 0], sizes = [64, 8], strides = [1, 1]} : vector<136x8xf32> to vector<64x8xf32>
    %26 = vector.extract_strided_slice %24 {offsets = [64, 0], sizes = [64, 8], strides = [1, 1]} : vector<136x8xf32> to vector<64x8xf32>
    %27 = vector.extract_strided_slice %24 {offsets = [128, 0], sizes = [8, 8], strides = [1, 1]} : vector<136x8xf32> to vector<8x8xf32>
    %28 = arith.mulf %25, %26 : vector<64x8xf32>
    %29 = tpu.concatenate %25, %28, %26 in 1 : vector<64x8xf32>, vector<64x8xf32>, vector<64x8xf32> -> vector<64x24xf32>
    %30 = arith.truncf %29 : vector<64x24xf32> to vector<64x24xbf16>
    %cst_20 = arith.constant dense<0.000000e+00> : vector<64x64xf32>
    %31 = tpu.matmul %30, %7, %cst_20 {dimension_numbers = #tpu.dot_dimension_numbers<[1], [0], [0], [1], [0, 0, 1, 1], [], []>} : vector<64x24xbf16>, vector<24x64xbf16>, vector<64x64xf32> -> vector<64x64xf32>
    %32 = arith.extf %8 : vector<1x64xbf16> to vector<1x64xf32>
    %33 = vector.broadcast %32 : vector<1x64xf32> to vector<64x64xf32>
    %34 = arith.addf %31, %33 : vector<64x64xf32>
    %35 = arith.extf %11 : vector<1x64xbf16> to vector<1x64xf32>
    %36 = vector.broadcast %35 : vector<1x64xf32> to vector<64x64xf32>
    %37 = arith.mulf %34, %36 : vector<64x64xf32>
    %38 = arith.extf %12 : vector<1x64xbf16> to vector<1x64xf32>
    %39 = vector.broadcast %38 : vector<1x64xf32> to vector<64x64xf32>
    %40 = arith.addf %37, %39 : vector<64x64xf32>
    %41 = arith.negf %40 : vector<64x64xf32>
    %42 = math.exp %41 : vector<64x64xf32>
    %cst_21 = arith.constant 1.000000e+00 : f32
    %43 = vector.broadcast %cst_21 : f32 to vector<64x64xf32>
    %44 = arith.addf %43, %42 : vector<64x64xf32>
    %45 = arith.divf %43, %44 : vector<64x64xf32>
    %46 = arith.extf %10 : vector<1x64xbf16> to vector<1x64xf32>
    %47 = vector.broadcast %46 : vector<1x64xf32> to vector<64x64xf32>
    %48 = arith.mulf %47, %45 : vector<64x64xf32>
    %49 = arith.extf %9 : vector<1x64xbf16> to vector<1x64xf32>
    %50 = vector.broadcast %49 : vector<1x64xf32> to vector<64x64xf32>
    %51 = arith.addf %50, %48 : vector<64x64xf32>
    %52 = arith.mulf %34, %51 : vector<64x64xf32>
    %53 = arith.extf %13 : vector<1x64xbf16> to vector<1x64xf32>
    %54 = vector.broadcast %53 : vector<1x64xf32> to vector<64x64xf32>
    %55 = arith.mulf %52, %54 : vector<64x64xf32>
    %cst_22 = arith.constant dense<0.000000e+00> : vector<64xf32>
    %56 = vector.multi_reduction <add>, %55, %cst_22 [1] : vector<64x64xf32> to vector<64xf32>
    %57 = vector.shape_cast %56 : vector<64xf32> to vector<64x1xf32>
    %58 = arith.extf %5 : vector<1x1xbf16> to vector<1x1xf32>
    %59 = vector.broadcast %58 : vector<1x1xf32> to vector<64x1xf32>
    %60 = arith.addf %57, %59 : vector<64x1xf32>
    %61 = vector.broadcast %60 : vector<64x1xf32> to vector<64x8xf32>
    %62 = arith.mulf %25, %61 : vector<64x8xf32>
    %63 = arith.truncf %62 : vector<64x8xf32> to vector<64x8xbf16>
    %cst_23 = arith.constant dense<0.000000e+00> : vector<8x8xf32>
    %64 = tpu.matmul %1, %63, %cst_23 {dimension_numbers = #tpu.dot_dimension_numbers<[1], [0], [0], [1], [0, 0, 1, 1], [], []>} : vector<8x64xbf16>, vector<64x8xbf16>, vector<8x8xf32> -> vector<8x8xf32>
    %65 = tpu.concatenate %27, %64 in 1 : vector<8x8xf32>, vector<8x8xf32> -> vector<8x16xf32>
    %66 = arith.truncf %65 : vector<8x16xf32> to vector<8x16xbf16>
    %cst_24 = arith.constant dense<0.000000e+00> : vector<8x32xf32>
    %67 = tpu.matmul %66, %14, %cst_24 {dimension_numbers = #tpu.dot_dimension_numbers<[1], [0], [0], [1], [0, 0, 1, 1], [], []>} : vector<8x16xbf16>, vector<16x32xbf16>, vector<8x32xf32> -> vector<8x32xf32>
    %68 = arith.extf %15 : vector<1x32xbf16> to vector<1x32xf32>
    %69 = vector.broadcast %68 : vector<1x32xf32> to vector<8x32xf32>
    %70 = arith.addf %67, %69 : vector<8x32xf32>
    %71 = arith.extf %18 : vector<1x32xbf16> to vector<1x32xf32>
    %72 = vector.broadcast %71 : vector<1x32xf32> to vector<8x32xf32>
    %73 = arith.mulf %70, %72 : vector<8x32xf32>
    %74 = arith.extf %19 : vector<1x32xbf16> to vector<1x32xf32>
    %75 = vector.broadcast %74 : vector<1x32xf32> to vector<8x32xf32>
    %76 = arith.addf %73, %75 : vector<8x32xf32>
    %77 = arith.negf %76 : vector<8x32xf32>
    %78 = math.exp %77 : vector<8x32xf32>
    %cst_25 = arith.constant 1.000000e+00 : f32
    %79 = vector.broadcast %cst_25 : f32 to vector<8x32xf32>
    %80 = arith.addf %79, %78 : vector<8x32xf32>
    %81 = arith.divf %79, %80 : vector<8x32xf32>
    %82 = arith.extf %17 : vector<1x32xbf16> to vector<1x32xf32>
    %83 = vector.broadcast %82 : vector<1x32xf32> to vector<8x32xf32>
    %84 = arith.mulf %83, %81 : vector<8x32xf32>
    %85 = arith.extf %16 : vector<1x32xbf16> to vector<1x32xf32>
    %86 = vector.broadcast %85 : vector<1x32xf32> to vector<8x32xf32>
    %87 = arith.addf %86, %84 : vector<8x32xf32>
    %88 = arith.mulf %70, %87 : vector<8x32xf32>
    %89 = arith.extf %20 : vector<1x32xbf16> to vector<1x32xf32>
    %90 = vector.broadcast %89 : vector<1x32xf32> to vector<8x32xf32>
    %91 = arith.mulf %88, %90 : vector<8x32xf32>
    %cst_26 = arith.constant dense<0.000000e+00> : vector<8xf32>
    %92 = vector.multi_reduction <add>, %91, %cst_26 [1] : vector<8x32xf32> to vector<8xf32>
    %93 = vector.shape_cast %92 : vector<8xf32> to vector<8x1xf32>
    %94 = arith.extf %6 : vector<1x1xbf16> to vector<1x1xf32>
    %95 = vector.broadcast %94 : vector<1x1xf32> to vector<8x1xf32>
    %96 = arith.addf %93, %95 : vector<8x1xf32>
    %97 = arith.negf %96 : vector<8x1xf32>
    %98 = math.exp %97 : vector<8x1xf32>
    %cst_27 = arith.constant 1.000000e+00 : f32
    %99 = vector.broadcast %cst_27 : f32 to vector<8x1xf32>
    %100 = arith.addf %99, %98 : vector<8x1xf32>
    %101 = arith.divf %99, %100 : vector<8x1xf32>
    %102 = vector.shape_cast %101 : vector<8x1xf32> to vector<1x8xf32>
    %c0_28 = arith.constant 0 : index
    %c0_29 = arith.constant 0 : index
    %103 = vector.load %arg3[%c0_28, %c0_29] : memref<1x8xf32, #tpu.memory_space<vmem>>, vector<1x8xf32>
    tpu.vector_store %arg3[%c0_28, %c0_29], %102 {strides = array<i32>} : memref<1x8xf32, #tpu.memory_space<vmem>>, vector<1x8xf32>,
    return
  }
  func.func @transform_0(%arg0: i32) -> (i32, i32) {
    %c0_i32 = arith.constant 0 : i32
    %c0_i32_0 = arith.constant 0 : i32
    %c0_i32_1 = arith.constant 0 : i32
    return %c0_i32, %c0_i32_0 : i32, i32
  }
  func.func @transform_1(%arg0: i32) -> (i32, i32) {
    %c0_i32 = arith.constant 0 : i32
    %c0_i32_0 = arith.constant 0 : i32
    %c0_i32_1 = arith.constant 0 : i32
    return %c0_i32, %c0_i32_0 : i32, i32
  }
  func.func @transform_2(%arg0: i32) -> (i32, i32) {
    %c0_i32 = arith.constant 0 : i32
    %c0_i32_0 = arith.constant 0 : i32
    %c0_i32_1 = arith.constant 0 : i32
    return %c0_i32, %c0_i32_0 : i32, i32
  }
}

</mosaic_0001>

<bundles_post_ra>
// kernel: tpu_custom_call.1
= control target key start
LH: loop header
LB: loop body
LE: loop exit
PB: predicated region body
PF: predicated region fallthrough
CT: control target
= control target key end

     0   :  { %vm96_vm0 = vcmask 130048   ;;  %s1252_s0 = inlined_call_operand.vmem [shape: bf16[144,64], index: 0, kind: input, shape index: {}]   ;;  %s1253_s1 = inlined_call_operand.vmem [shape: bf16[80,128], index: 1, kind: input, shape index: {}]   ;;  %s1254_s2 = inlined_call_operand.hbm [shape: f32[1,8], index: 2, kind: output, shape index: {}]  }
   0x1   :  { %v825_v0 = vld [vmem:[%s1253_s1] sm:$0xff]  ;;  %v823_v3 = vld [vmem:[%s1252_s0 + $0x30] sm:$0xff] }
   0x2   :  { %v817_v1 = vld [vmem:[%s1252_s0] sm:$0xff]  ;;  %131 = vmatpush.bf16.msra.mxu0 %v825_v0  ;;  %828 = vmatpush.bf16.msra.mxu2 %v825_v0 }
   0x3   :  { %v821_v2 = vld [vmem:[%s1252_s0 + $0x20] sm:$0xff] }
   0x4   :  { %7 = vsyncpa [#allocation3], 0  ;;  %829 = vmatpush.bf16.msra.mxu3 %v825_v0  ;;  %v818_v4 = vld [vmem:[%s1252_s0 + $0x8] sm:$0xff]  ;;  %v824_v6 = vld [vmem:[%s1252_s0 + $0x38] sm:$0xff]  ;;  %s945_s29 = smov 8   ;;  %s946_s30 = smov 16  }
   0x5   :  { %784 = vmatmul.msk.bf16.vlgmr.msra.gmra.mxu0 %vm96_vm0, %v817_v1  ;;  %788 = vmatmul.msk.bf16.vlgmr.msra.gmra.mxu2 %vm96_vm0, %v821_v2  ;;  %v822_v5 = vld [vmem:[%s1252_s0 + $0x28] sm:$0xff]  ;;  %v819_v7 = vld [vmem:[%s1252_s0 + $0x10] sm:$0xff]  ;;  %v820_v8 = vld [vmem:[%s1252_s0 + $0x18] sm:$0xff]  ;;  %vm294_vm1 = vcmask 1043456   ;;  %vm249_vm2 = vcmask 64512   ;;  %vm281_vm3 = vcmask 195584  }
   0x6   :  { %v1003_v10 = vld [vmem:[%s1253_s1 + $0x8] sm:$0x1]  ;;  %v36_v60 = vld [vmem:[%s1253_s1 + $0x14] sm:$0xf]  ;;  %v826_v0 = vld [vmem:[%s1253_s1 + $0xc] sm:$0xff]  ;;  %vm534_vm12 = vcmask 523264  }
   0x7   :  { %790 = vmatmul.msk.bf16.vlgmr.msra.gmra.mxu3 %vm96_vm0, %v823_v3  ;;  %v45_v11 = vunpack.c.l.bf16 %v1003_v10  ;;  %v277_v61 = vunpack.c.l.b16 %v36_v60  ;;  %s739_s27 = sshll.u32 %s1254_s2, 4  ;;  %s740_s27 = int_to_ptr.hbm [resolvable:$true] %s739_s27 }
   0x9   :  { %v1008_v14 = vperm.slane %v45_v11, 0  ;;  %v279_v62 = vpack.c.b16 %v277_v61, %v277_v61 }
   0xb   :  { %v296_v63 = vsel %vm294_vm1, %v279_v62, 0 }
   0xc   :  { %304 = vmatpush.bf16.msra.mxu1 %v296_v63 }
  0x10   :  { %305 = vmatpush.bf16.msra.mxu1 %v826_v0 }
  0x15   :  { %785 = vmatmul.msk.bf16.gmra.mxu0 %vm96_vm0, %v818_v4  ;;  %789 = vmatmul.msk.bf16.gmra.mxu2 %vm96_vm0, %v822_v5 }
  0x17   :  { %791 = vmatmul.msk.bf16.gmra.mxu3 %vm96_vm0, %v824_v6 }
  0x25   :  { %786 = vmatmul.msk.bf16.gmra.mxu0 %vm96_vm0, %v819_v7 }
  0x35   :  { %787 = vmatmul.msk.bf16.gmra.mxu0 %vm96_vm0, %v820_v8 }
  0x82   :  { %v133_v9 = vpop.f32.mrf.mxu0 }
  0x83   :  { %v1011_v15 = vadd.f32 %v133_v9, %v1008_v14 }
  0x88   :  { %v153_v12 = vpop.f32.mrf.mxu2 }
  0x89   :  { %v154_v16 = vadd.f32 %v153_v12, %v1008_v14 }
  0x8a   :  { %v135_v13 = vpop.f32.mrf.mxu0  ;;  %v163_v18 = vpop.f32.mrf.mxu3 }
  0x8b   :  { %v1015_v19 = vadd.f32 %v135_v13, %v1008_v14  ;;  %v177_v22 = vmul.f32 %v154_v16, %v1011_v15  ;;  %v164_v40 = vadd.f32 %v163_v18, %v1008_v14 }
  0x90   :  { %v155_v17 = vpop.f32.mrf.mxu2 }
  0x91   :  { %v156_v20 = vadd.f32 %v155_v17, %v1008_v14 }
  0x92   :  { %v138_v21 = vpop.f32.mrf.mxu0  ;;  %v165_v27 = vpop.f32.mrf.mxu3 }
  0x93   :  { %v178_v23 = vmul.f32 %v156_v20, %v1015_v19  ;;  %v840_v28 = vpack.i.bf16 %v156_v20, %v154_v16  ;;  %v1022_v29 = vadd.f32 %v138_v21, %v1008_v14  ;;  %v166_v41 = vadd.f32 %v165_v27, %v1008_v14 }
  0x95   :  { %v835_v24 = vpack.i.bf16 %v178_v23, %v177_v22  ;;  %v860_v53 = vpack.i.bf16 %v166_v41, %v164_v40 }
  0x97   :  { %836 = vrot.lane.b32.xlu0 %v835_v24, %s945_s29 }
  0x98   :  { %v158_v25 = vpop.f32.mrf.mxu2 }
  0x99   :  { %v159_v30 = vadd.f32 %v158_v25, %v1008_v14 }
  0x9a   :  { %v140_v26 = vpop.f32.mrf.mxu0  ;;  %v168_v37 = vpop.f32.mrf.mxu3 }
  0x9b   :  { %v1026_v32 = vadd.f32 %v140_v26, %v1008_v14  ;;  %v179_v35 = vmul.f32 %v159_v30, %v1022_v29  ;;  %v169_v49 = vadd.f32 %v168_v37, %v1008_v14 }
  0x9f   :  { %841 = vrot.lane.b32.xlu0 %v840_v28, %s946_s30 }
  0xa0   :  { %v160_v31 = vpop.f32.mrf.mxu2 }
  0xa1   :  { %v161_v33 = vadd.f32 %v160_v31, %v1008_v14 }
  0xa2   :  { %v143_v34 = vpop.f32.mrf.mxu0  ;;  %v170_v47 = vpop.f32.mrf.mxu3 }
  0xa3   :  { %v180_v36 = vmul.f32 %v161_v33, %v1026_v32  ;;  %v1032_v39 = vadd.f32 %v143_v34, %v1008_v14  ;;  %v850_v45 = vpack.i.bf16 %v161_v33, %v159_v30  ;;  %v171_v50 = vadd.f32 %v170_v47, %v1008_v14 }
  0xa5   :  { %v845_v38 = vpack.i.bf16 %v180_v36, %v179_v35  ;;  %v181_v43 = vmul.f32 %v164_v40, %v1032_v39  ;;  %v870_v52 = vpack.i.bf16 %v171_v50, %v169_v49 }
  0xa7   :  { %846 = vrot.lane.b32.xlu1 %v845_v38, %s945_s29 }
  0xaa   :  { %v145_v42 = vpop.f32.mrf.mxu0 }
  0xab   :  { %v1039_v44 = vadd.f32 %v145_v42, %v1008_v14 }
  0xad   :  { %v182_v46 = vmul.f32 %v166_v41, %v1039_v44 }
  0xaf   :  { %851 = vrot.lane.b32.xlu1 %v850_v45, %s946_s30  ;;  %v855_v48 = vpack.i.bf16 %v182_v46, %v181_v43 }
  0xb1   :  { %856 = vrot.lane.b32.xlu2 %v855_v48, %s945_s29 }
  0xb2   :  { %v148_v51 = vpop.f32.mrf.mxu0 }
  0xb3   :  { %v1046_v54 = vadd.f32 %v148_v51, %v1008_v14 }
  0xb5   :  { %v183_v56 = vmul.f32 %v169_v49, %v1046_v54 }
  0xb7   :  { %871 = vrot.lane.b32.xlu1 %v870_v52, %s946_s30 }
  0xb9   :  { %861 = vrot.lane.b32.xlu2 %v860_v53, %s946_s30 }
  0xba   :  { %v150_v55 = vpop.f32.mrf.mxu0 }
  0xbb   :  { %v1050_v57 = vadd.f32 %v150_v55, %v1008_v14  ;;  %v37_v55 = vld [vmem:[%s1253_s1 + $0x18] sm:$0x1] }
  0xbd   :  { %v184_v58 = vmul.f32 %v171_v50, %v1050_v57 }
  0xbf   :  { %v865_v59 = vpack.i.bf16 %v184_v58, %v183_v56  ;;  %v38_v56 = vld [vmem:[%s1253_s1 + $0x18] sm:$0x2]  ;;  %v270_v58 = vunpack.c.l.bf16 %v37_v55 }
  0xc0   :  { %v327_v60 = vunpack.c.l.bf16 %v38_v56 }
  0xc1   :  { %866 = vrot.lane.b32.xlu0 %v865_v59, %s945_s29  ;;  %v1097_v59 = vld [vmem:[%s1253_s1 + $0x18] sm:$0x4]  ;;  %v1099_v61 = vperm.slane %v270_v58, 0 }
  0xc2   :  { %v337_v62 = vunpack.c.l.bf16 %v1097_v59  ;;  %v1102_v63 = vperm.slane %v327_v60, 3 }
 0x109   :  { %v837_v1 = vpop.permute.xlu0 %836 }
 0x10a   :  { %v839_v2 = vunpack.i.h.bf16 %v837_v1  ;;  %v838_v3 = vunpack.i.l.bf16 %v837_v1 }
 0x10b   :  { %v857_v20 = vpop.permute.xlu2 %856 }
 0x10c   :  { %v251_v7 = vsel %vm249_vm2, %v1015_v19, %v839_v2  ;;  %v250_v8 = vsel %vm249_vm2, %v1011_v15, %v838_v3  ;;  %v859_v31 = vunpack.i.h.bf16 %v857_v20  ;;  %v858_v33 = vunpack.i.l.bf16 %v857_v20 }
 0x10d   :  { %v1109_v2 = vperm.slane %v337_v62, 4 }
 0x10e   :  { %v255_v36 = vsel %vm249_vm2, %v1039_v44, %v859_v31  ;;  %v254_v37 = vsel %vm249_vm2, %v1032_v39, %v858_v33 }
 0x111   :  { %v842_v4 = vpop.permute.xlu0 %841 }
 0x112   :  { %v844_v5 = vunpack.i.h.bf16 %v842_v4  ;;  %v843_v6 = vunpack.i.l.bf16 %v842_v4 }
 0x113   :  { %v862_v30 = vpop.permute.xlu2 %861 }
 0x114   :  { %v258_v9 = vsel %vm96_vm0, %v250_v8, %v843_v6  ;;  %v259_v12 = vsel %vm96_vm0, %v251_v7, %v844_v5  ;;  %v864_v34 = vunpack.i.h.bf16 %v862_v30  ;;  %v863_v35 = vunpack.i.l.bf16 %v862_v30 }
 0x115   :  { %v266_v13 = vpack.c.bf16 %v259_v12, %v258_v9 }
 0x116   :  { %v262_v38 = vsel %vm96_vm0, %v254_v37, %v863_v35  ;;  %v263_v40 = vsel %vm96_vm0, %v255_v36, %v864_v34 }
 0x117   :  { %797 = vmatmul.msk.bf16.vlgmr.msra.gmra.mxu1 %vm281_vm3, %v266_v13  ;;  %v268_v41 = vpack.c.bf16 %v263_v40, %v262_v38  ;;  %v1132_v40 = vperm.slane %v327_v60, 2 }
 0x119   :  { %v847_v16 = vpop.permute.xlu1 %846 }
 0x11a   :  { %v849_v17 = vunpack.i.h.bf16 %v847_v16  ;;  %v848_v18 = vunpack.i.l.bf16 %v847_v16 }
 0x11c   :  { %v253_v24 = vsel %vm249_vm2, %v1026_v32, %v849_v17  ;;  %v252_v25 = vsel %vm249_vm2, %v1022_v29, %v848_v18 }
 0x121   :  { %v852_v21 = vpop.permute.xlu1 %851 }
 0x122   :  { %v854_v22 = vunpack.i.h.bf16 %v852_v21  ;;  %v853_v23 = vunpack.i.l.bf16 %v852_v21 }
 0x124   :  { %v260_v26 = vsel %vm96_vm0, %v252_v25, %v853_v23  ;;  %v261_v27 = vsel %vm96_vm0, %v253_v24, %v854_v22 }
 0x125   :  { %v267_v28 = vpack.c.bf16 %v261_v27, %v260_v26 }
 0x127   :  { %798 = vmatmul.msk.bf16.gmra.mxu1 %vm281_vm3, %v267_v28 }
 0x129   :  { %v872_v46 = vpop.permute.xlu1 %871 }
 0x12a   :  { %v874_v47 = vunpack.i.h.bf16 %v872_v46  ;;  %v873_v48 = vunpack.i.l.bf16 %v872_v46 }
 0x133   :  { %v867_v42 = vpop.permute.xlu0 %866 }
 0x134   :  { %v869_v43 = vunpack.i.h.bf16 %v867_v42  ;;  %v868_v45 = vunpack.i.l.bf16 %v867_v42 }
 0x136   :  { %v257_v49 = vsel %vm249_vm2, %v1050_v57, %v869_v43  ;;  %v256_v50 = vsel %vm249_vm2, %v1046_v54, %v868_v45  ;;  %v1134_v45 = vperm.slane %v270_v58, 1 }
 0x137   :  { %799 = vmatmul.msk.bf16.gmra.mxu1 %vm281_vm3, %v268_v41  ;;  %v264_v51 = vsel %vm96_vm0, %v256_v50, %v873_v48  ;;  %v265_v52 = vsel %vm96_vm0, %v257_v49, %v874_v47 }
 0x138   :  { %v269_v53 = vpack.c.bf16 %v265_v52, %v264_v51 }
 0x147   :  { %800 = vmatmul.msk.bf16.gmra.mxu1 %vm281_vm3, %v269_v53 }
 0x194   :  { %v307_v0 = vpop.f32.mrf.mxu1 }
 0x195   :  { %v1105_v1 = vadd.f32 %v307_v0, %v1099_v61 }
 0x197   :  { %v329_v3 = vmul.f32 %v1102_v63, %v1105_v1 }
 0x199   :  { %v339_v4 = vadd.f32 %v1109_v2, %v329_v3 }
 0x19b   :  { %v801_v5 = vmul.f32 -1.442695, %v339_v4 }
 0x19c   :  { %v309_v6 = vpop.f32.mrf.mxu1 }
 0x19d   :  { %879 = vpow2.f32 %v801_v5  ;;  %v1115_v7 = vadd.f32 %v309_v6, %v1099_v61 }
 0x19f   :  { %v330_v8 = vmul.f32 %v1102_v63, %v1115_v7 }
 0x1a1   :  { %v340_v9 = vadd.f32 %v1109_v2, %v330_v8 }
 0x1a3   :  { %v880_v12 = vpop.eup %879  ;;  %v802_v13 = vmul.f32 -1.442695, %v340_v9 }
 0x1a4   :  { %v371_v16 = vadd.f32 1.0, %v880_v12  ;;  %v312_v17 = vpop.f32.mrf.mxu1 }
 0x1a5   :  { %881 = vpow2.f32 %v802_v13  ;;  %v1121_v18 = vadd.f32 %v312_v17, %v1099_v61 }
 0x1a6   :  { %883 = vrcp.f32 %v371_v16  ;;  %v390_v33 = vand.u32 2147483648, %v371_v16  ;;  %v388_v35 = vand.u32 2147483647, %v371_v16  ;;  %vm384_vm5 = vweird.f32 %v371_v16 }
 0x1a7   :  { %v331_v20 = vmul.f32 %v1102_v63, %v1121_v18 }
 0x1a8   :  { %v391_v43 = vor.u32 1.1754944e-38, %v390_v33  ;;  %vm389_vm7 = vcmp.eq.f32.partialorder %v388_v35, 8.507059e+37 }
 0x1a9   :  { %v341_v21 = vadd.f32 %v1109_v2, %v331_v20 }
 0x1ab   :  { %v882_v22 = vpop.eup %881  ;;  %v803_v23 = vmul.f32 -1.442695, %v341_v21 }
 0x1ac   :  { %v884_v24 = vpop.eup %883  ;;  %v372_v25 = vadd.f32 1.0, %v882_v22  ;;  %v314_v26 = vpop.f32.mrf.mxu1 }
 0x1ad   :  { %v380_v27 = vmul.f32 %v884_v24, %v371_v16  ;;  %885 = vpow2.f32 %v803_v23  ;;  %v1127_v28 = vadd.f32 %v314_v26, %v1099_v61  ;;  %vm385_vm4 = vweird.f32 %v884_v24 }
 0x1ae   :  { %887 = vrcp.f32 %v372_v25  ;;  %vm386_vm6 = vmor %vm384_vm5, %vm385_vm4  ;;  %v403_v55 = vand.u32 2147483647, %v372_v25  ;;  %v405_v56 = vand.u32 2147483648, %v372_v25  ;;  %vm399_vm9 = vweird.f32 %v372_v25 }
 0x1af   :  { %v381_v30 = vsub.f32 1.0, %v380_v27  ;;  %v332_v31 = vmul.f32 %v1102_v63, %v1127_v28  ;;  %v1147_v16 = vperm.slane %v337_v62, 5 }
 0x1b0   :  { %v406_v9 = vor.u32 1.1754944e-38, %v405_v56  ;;  %vm404_vm11 = vcmp.eq.f32.partialorder %v403_v55, 8.507059e+37 }
 0x1b1   :  { %v382_v34 = vmul.f32 %v884_v24, %v381_v30  ;;  %v342_v36 = vadd.f32 %v1109_v2, %v332_v31 }
 0x1b3   :  { %v886_v37 = vpop.eup %885  ;;  %v383_v38 = vadd.f32 %v884_v24, %v382_v34  ;;  %v804_v41 = vmul.f32 -1.442695, %v342_v36 }
 0x1b4   :  { %v888_v42 = vpop.eup %887  ;;  %v373_v46 = vadd.f32 1.0, %v886_v37  ;;  %v317_v47 = vpop.f32.mrf.mxu1 }
 0x1b5   :  { %v387_v48 = vsel %vm386_vm6, %v884_v24, %v383_v38  ;;  %v395_v49 = vmul.f32 %v888_v42, %v372_v25  ;;  %889 = vpow2.f32 %v804_v41  ;;  %v1138_v53 = vadd.f32 %v317_v47, %v1099_v61 }
 0x1b6   :  { %v392_v50 = vsel %vm389_vm7, %v391_v43, %v387_v48  ;;  %891 = vrcp.f32 %v373_v46  ;;  %vm400_vm8 = vweird.f32 %v888_v42  ;;  %v418_v27 = vand.u32 2147483647, %v373_v46 }
 0x1b7   :  { %v500_v51 = vmul.f32 %v1132_v40, %v392_v50  ;;  %v396_v52 = vsub.f32 1.0, %v395_v49  ;;  %v333_v0 = vmul.f32 %v1102_v63, %v1138_v53  ;;  %vm401_vm10 = vmor %vm399_vm9, %vm400_vm8  ;;  %vm414_vm14 = vweird.f32 %v373_v46 }
 0x1b8   :  { %vm419_vm1 = vcmp.eq.f32.partialorder %v418_v27, 8.507059e+37 }
 0x1b9   :  { %v509_v60 = vadd.f32 %v1134_v45, %v500_v51  ;;  %v397_v58 = vmul.f32 %v888_v42, %v396_v52  ;;  %v343_v5 = vadd.f32 %v1109_v2, %v333_v0 }
 0x1bb   :  { %v890_v3 = vpop.eup %889  ;;  %v398_v4 = vadd.f32 %v888_v42, %v397_v58  ;;  %v517_v8 = vmul.f32 %v509_v60, %v1105_v1  ;;  %v805_v21 = vmul.f32 -1.442695, %v343_v5  ;;  %v420_v1 = vand.u32 2147483648, %v373_v46 }
 0x1bc   :  { %v892_v6 = vpop.eup %891  ;;  %v374_v12 = vadd.f32 1.0, %v890_v3  ;;  %v319_v13 = vpop.f32.mrf.mxu1 }
 0x1bd   :  { %v402_v17 = vsel %vm401_vm10, %v888_v42, %v398_v4  ;;  %v410_v20 = vmul.f32 %v892_v6, %v373_v46  ;;  %v1151_v25 = vadd.f32 %v319_v13, %v1099_v61  ;;  %v526_v26 = vmul.f32 %v1147_v16, %v517_v8 }
 0x1be   :  { %v407_v22 = vsel %vm404_vm11, %v406_v9, %v402_v17  ;;  %893 = vrcp.f32 %v374_v12  ;;  %vm415_vm13 = vweird.f32 %v892_v6  ;;  %v421_v36 = vor.u32 1.1754944e-38, %v420_v1 }
 0x1bf   :  { %v501_v23 = vmul.f32 %v1132_v40, %v407_v22  ;;  %v411_v24 = vsub.f32 1.0, %v410_v20  ;;  %895 = vpow2.f32 %v805_v21  ;;  %v334_v30 = vmul.f32 %v1102_v63, %v1151_v25  ;;  %vm416_vm15 = vmor %vm414_vm14, %vm415_vm13 }
 0x1c0   :  { %v535_v31 = vsel %vm534_vm12, %v526_v26, 0.0  ;;  %v433_v55 = vand.u32 2147483647, %v374_v12  ;;  %v435_v56 = vand.u32 2147483648, %v374_v12  ;;  %vm429_vm4 = vweird.f32 %v374_v12 }
 0x1c1   :  { %v510_v59 = vadd.f32 %v1134_v45, %v501_v23  ;;  %v412_v62 = vmul.f32 %v892_v6, %v411_v24  ;;  %536 = vadd.xlane.f32.xlu1 %v535_v31  ;;  %v344_v37 = vadd.f32 %v1109_v2, %v334_v30 }
 0x1c2   :  { %vm434_vm6 = vcmp.eq.f32.partialorder %v433_v55, 8.507059e+37  ;;  %v436_v8 = vor.u32 1.1754944e-38, %v435_v56 }
 0x1c3   :  { %v518_v33 = vmul.f32 %v510_v59, %v1115_v7  ;;  %v413_v34 = vadd.f32 %v892_v6, %v412_v62  ;;  %v806_v50 = vmul.f32 -1.442695, %v344_v37 }
 0x1c4   :  { %v894_v35 = vpop.eup %893  ;;  %v322_v38 = vpop.f32.mrf.mxu1 }
 0x1c5   :  { %v896_v41 = vpop.eup %895  ;;  %v417_v42 = vsel %vm416_vm15, %v892_v6, %v413_v34  ;;  %v425_v43 = vmul.f32 %v894_v35, %v374_v12  ;;  %v1161_v47 = vadd.f32 %v322_v38, %v1099_v61  ;;  %v527_v7 = vmul.f32 %v1147_v16, %v518_v33 }
 0x1c6   :  { %v422_v48 = vsel %vm419_vm1, %v421_v36, %v417_v42  ;;  %v375_v49 = vadd.f32 1.0, %v896_v41  ;;  %vm430_vm3 = vweird.f32 %v894_v35 }
 0x1c7   :  { %v502_v46 = vmul.f32 %v1132_v40, %v422_v48  ;;  %v426_v51 = vsub.f32 1.0, %v425_v43  ;;  %v335_v52 = vmul.f32 %v1102_v63, %v1161_v47  ;;  %v538_v3 = vsel %vm534_vm12, %v527_v7, 0.0  ;;  %vm431_vm5 = vmor %vm429_vm4, %vm430_vm3 }
 0x1c8   :  { %897 = vrcp.f32 %v375_v49  ;;  %539 = vadd.xlane.f32.xlu2 %v538_v3  ;;  %v448_v27 = vand.u32 2147483647, %v375_v49  ;;  %v450_v30 = vand.u32 2147483648, %v375_v49  ;;  %vm444_vm8 = vweird.f32 %v375_v49 }
 0x1c9   :  { %v511_v60 = vadd.f32 %v1134_v45, %v502_v46  ;;  %v427_v58 = vmul.f32 %v894_v35, %v426_v51  ;;  %899 = vpow2.f32 %v806_v50  ;;  %v345_v0 = vadd.f32 %v1109_v2, %v335_v52 }
 0x1ca   :  { %v451_v38 = vor.u32 1.1754944e-38, %v450_v30  ;;  %vm449_vm10 = vcmp.eq.f32.partialorder %v448_v27, 8.507059e+37 }
 0x1cb   :  { %v519_v4 = vmul.f32 %v511_v60, %v1121_v18  ;;  %v428_v5 = vadd.f32 %v894_v35, %v427_v58  ;;  %v807_v6 = vmul.f32 -1.442695, %v345_v0 }
 0x1cc   :  { %v324_v9 = vpop.f32.mrf.mxu1 }
 0x1cd   :  { %v432_v13 = vsel %vm431_vm5, %v894_v35, %v428_v5  ;;  %901 = vpow2.f32 %v807_v6  ;;  %v1172_v17 = vadd.f32 %v324_v9, %v1099_v61  ;;  %v528_v20 = vmul.f32 %v1147_v16, %v519_v4 }
 0x1ce   :  { %v898_v21 = vpop.eup %897  ;;  %v437_v22 = vsel %vm434_vm6, %v436_v8, %v432_v13 }
 0x1cf   :  { %v900_v23 = vpop.eup %899  ;;  %v503_v18 = vmul.f32 %v1132_v40, %v437_v22  ;;  %v440_v24 = vmul.f32 %v898_v21, %v375_v49  ;;  %v336_v12 = vmul.f32 %v1102_v63, %v1172_v17  ;;  %v541_v26 = vsel %vm534_vm12, %v528_v20, 0.0 }
 0x1d0   :  { %v376_v1 = vadd.f32 1.0, %v900_v23  ;;  %vm445_vm7 = vweird.f32 %v898_v21  ;;  %542 = vadd.xlane.f32.xlu2 %v541_v26 }
 0x1d1   :  { %v512_v59 = vadd.f32 %v1134_v45, %v503_v18  ;;  %v441_v62 = vsub.f32 1.0, %v440_v24  ;;  %v346_v61 = vadd.f32 %v1109_v2, %v336_v12  ;;  %vm446_vm9 = vmor %vm444_vm8, %vm445_vm7 }
 0x1d2   :  { %903 = vrcp.f32 %v376_v1  ;;  %v463_v51 = vand.u32 2147483647, %v376_v1  ;;  %v465_v52 = vand.u32 2147483648, %v376_v1  ;;  %vm459_vm13 = vweird.f32 %v376_v1 }
 0x1d3   :  { %v902_v31 = vpop.eup %901  ;;  %v520_v33 = vmul.f32 %v512_v59, %v1127_v28  ;;  %v442_v34 = vmul.f32 %v898_v21, %v441_v62  ;;  %v808_v35 = vmul.f32 -1.442695, %v346_v61 }
 0x1d4   :  { %v377_v36 = vadd.f32 1.0, %v902_v31  ;;  %vm464_vm15 = vcmp.eq.f32.partialorder %v463_v51, 8.507059e+37  ;;  %v466_v5 = vor.u32 1.1754944e-38, %v465_v52 }
 0x1d5   :  { %v443_v63 = vadd.f32 %v898_v21, %v442_v34  ;;  %905 = vpow2.f32 %v808_v35  ;;  %v529_v37 = vmul.f32 %v1147_v16, %v520_v33 }
 0x1d6   :  { %907 = vrcp.f32 %v377_v36  ;;  %v478_v6 = vand.u32 2147483647, %v377_v36  ;;  %v480_v8 = vand.u32 2147483648, %v377_v36  ;;  %vm474_vm3 = vweird.f32 %v377_v36 }
 0x1d7   :  { %v447_v2 = vsel %vm446_vm9, %v898_v21, %v443_v63  ;;  %v544_v41 = vsel %vm534_vm12, %v529_v37, 0.0 }
 0x1d8   :  { %v904_v42 = vpop.eup %903  ;;  %v452_v43 = vsel %vm449_vm10, %v451_v38, %v447_v2  ;;  %545 = vadd.xlane.f32.xlu0 %v544_v41  ;;  %v481_v18 = vor.u32 1.1754944e-38, %v480_v8  ;;  %vm479_vm5 = vcmp.eq.f32.partialorder %v478_v6, 8.507059e+37 }
 0x1d9   :  { %v504_v28 = vmul.f32 %v1132_v40, %v452_v43  ;;  %v455_v48 = vmul.f32 %v904_v42, %v376_v1  ;;  %vm460_vm11 = vweird.f32 %v904_v42 }
 0x1da   :  { %vm461_vm14 = vmor %vm459_vm13, %vm460_vm11  ;;  %vm698_vm11 = vcmask 261120  }
 0x1db   :  { %v906_v50 = vpop.eup %905  ;;  %v513_v7 = vadd.f32 %v1134_v45, %v504_v28  ;;  %v456_v49 = vsub.f32 1.0, %v455_v48 }
 0x1dc   :  { %v908_v46 = vpop.eup %907  ;;  %v378_v55 = vadd.f32 1.0, %v906_v50  ;;  %v947_v50 = vmov 0  }
 0x1dd   :  { %v521_v56 = vmul.f32 %v513_v7, %v1138_v53  ;;  %v457_v60 = vmul.f32 %v904_v42, %v456_v49  ;;  %v470_v58 = vmul.f32 %v908_v46, %v377_v36  ;;  %vm475_vm1 = vweird.f32 %v908_v46  ;;  %876 = vset.pattern.permute.xlu2 %v947_v50  ;;  %877 = vset.pattern.permute.xlu1 %v947_v50 }
 0x1de   :  { %909 = vrcp.f32 %v378_v55  ;;  %vm476_vm4 = vmor %vm474_vm3, %vm475_vm1  ;;  %v493_v27 = vand.u32 2147483647, %v378_v55  ;;  %v495_v30 = vand.u32 2147483648, %v378_v55  ;;  %vm489_vm7 = vweird.f32 %v378_v55  ;;  %875 = vset.pattern.permute.xlu0 %v947_v50 }
 0x1df   :  { %v458_v0 = vadd.f32 %v904_v42, %v457_v60  ;;  %v471_v3 = vsub.f32 1.0, %v470_v58  ;;  %v530_v4 = vmul.f32 %v1147_v16, %v521_v56  ;;  %vm730_vm3 = vcmask 57344  }
 0x1e0   :  { %v496_v37 = vor.u32 1.1754944e-38, %v495_v30  ;;  %vm494_vm9 = vcmp.eq.f32.partialorder %v493_v27, 8.507059e+37 }
 0x1e1   :  { %v462_v9 = vsel %vm461_vm14, %v904_v42, %v458_v0  ;;  %v472_v13 = vmul.f32 %v908_v46, %v471_v3  ;;  %v547_v20 = vsel %vm534_vm12, %v530_v4, 0.0  ;;  %v29_v4 = vld [vmem:[%s1252_s0 + $0x40] sm:$0xf] }
 0x1e2   :  { %v467_v53 = vsel %vm464_vm15, %v466_v5, %v462_v9  ;;  %548 = vadd.xlane.f32.xlu1 %v547_v20  ;;  %v80_v5 = vunpack.c.l.b16 %v29_v4 }
 0x1e3   :  { %v505_v21 = vmul.f32 %v1132_v40, %v467_v53  ;;  %v473_v22 = vadd.f32 %v908_v46, %v472_v13 }
 0x1e4   :  { %v910_v23 = vpop.eup %909  ;;  %v89_v8 = vpack.c.b16 %v80_v5, %v80_v5 }
 0x1e5   :  { %v514_v24 = vadd.f32 %v1134_v45, %v505_v21  ;;  %v477_v12 = vsel %vm476_vm4, %v908_v46, %v473_v22  ;;  %v485_v1 = vmul.f32 %v910_v23, %v378_v55  ;;  %vm490_vm6 = vweird.f32 %v910_v23 }
 0x1e6   :  { %v482_v26 = vsel %vm479_vm5, %v481_v18, %v477_v12  ;;  %vm491_vm8 = vmor %vm489_vm7, %vm490_vm6  ;;  %792 = vmatmul.msk.bf16.gmra.mxu3 %vm96_vm0, %v89_v8 }
 0x1e7   :  { %v522_v59 = vmul.f32 %v514_v24, %v1151_v25  ;;  %v506_v62 = vmul.f32 %v1132_v40, %v482_v26  ;;  %v486_v61 = vsub.f32 1.0, %v485_v1 }
 0x1e9   :  { %v515_v31 = vadd.f32 %v1134_v45, %v506_v62  ;;  %v487_v33 = vmul.f32 %v910_v23, %v486_v61  ;;  %v531_v34 = vmul.f32 %v1147_v16, %v522_v59 }
 0x1eb   :  { %v523_v35 = vmul.f32 %v515_v31, %v1161_v47  ;;  %v488_v36 = vadd.f32 %v910_v23, %v487_v33  ;;  %v550_v63 = vsel %vm534_vm12, %v531_v34, 0.0 }
 0x1ec   :  { %551 = vadd.xlane.f32.xlu2 %v550_v63  ;;  %v43_v63 = vld [vmem:[%s1253_s1 + $0x24] sm:$0x2] }
 0x1ed   :  { %v492_v25 = vsel %vm491_vm8, %v910_v23, %v488_v36  ;;  %v532_v38 = vmul.f32 %v1147_v16, %v523_v35  ;;  %v42_v36 = vld [vmem:[%s1253_s1 + $0x24] sm:$0x1] }
 0x1ee   :  { %v497_v2 = vsel %vm494_vm9, %v496_v37, %v492_v25  ;;  %v642_v37 = vunpack.c.l.bf16 %v42_v36  ;;  %v44_v25 = vld [vmem:[%s1253_s1 + $0x24] sm:$0x4] }
 0x1ef   :  { %v507_v41 = vmul.f32 %v1132_v40, %v497_v2  ;;  %v553_v43 = vsel %vm534_vm12, %v532_v38, 0.0  ;;  %v1206_v40 = vperm.slane %v45_v11, 1  ;;  %v669_v2 = vunpack.c.l.bf16 %v44_v25 }
 0x1f0   :  { %v643_v38 = vperm.slane %v642_v37, 0 }
 0x1f1   :  { %v516_v42 = vadd.f32 %v1134_v45, %v507_v41  ;;  %v696_v5 = vperm.slane %v669_v2, 5 }
 0x1f3   :  { %v524_v47 = vmul.f32 %v516_v42, %v1172_v17 }
 0x1f4   :  { %554 = vadd.xlane.f32.xlu2 %v553_v43 }
 0x1f5   :  { %v533_v28 = vmul.f32 %v1147_v16, %v524_v47  ;;  %v670_v47 = vperm.slane %v669_v2, 4 }
 0x1f7   :  { %v556_v48 = vsel %vm534_vm12, %v533_v28, 0.0 }
 0x1f8   :  { %557 = vadd.xlane.f32.xlu0 %v556_v48 }
 0x234   :  { %v537_v7 = vpop.xlane.xlu1 %536 }
 0x235   :  { %v560_v56 = vadd.f32 %v1206_v40, %v537_v7 }
 0x23b   :  { %v540_v49 = vpop.xlane.xlu2 %539 }
 0x23c   :  { %v561_v0 = vadd.f32 %v1206_v40, %v540_v49 }
 0x243   :  { %v543_v17 = vpop.xlane.xlu2 %542 }
 0x244   :  { %v562_v16 = vadd.f32 %v1206_v40, %v543_v17 }
 0x24b   :  { %v546_v55 = vpop.xlane.xlu0 %545 }
 0x24c   :  { %v563_v3 = vadd.f32 %v1206_v40, %v546_v55 }
 0x255   :  { %v549_v45 = vpop.xlane.xlu1 %548 }
 0x256   :  { %v564_v46 = vadd.f32 %v1206_v40, %v549_v45 }
 0x258   :  { %590 = vperm.xlu2 %876, %v564_v46  }
 0x25f   :  { %v552_v51 = vpop.xlane.xlu2 %551 }
 0x260   :  { %v565_v52 = vadd.f32 %v1206_v40, %v552_v51  ;;  %580 = vperm.xlu2 %876, %v562_v16  }
 0x262   :  { %595 = vperm.xlu1 %877, %v565_v52  }
 0x267   :  { %v555_v60 = vpop.xlane.xlu2 %554 }
 0x268   :  { %v566_v10 = vadd.f32 %v1206_v40, %v555_v60  ;;  %570 = vperm.xlu2 %876, %v560_v56  }
 0x26a   :  { %600 = vperm.xlu0 %875, %v566_v10  }
 0x26b   :  { %v558_v11 = vpop.xlane.xlu0 %557 }
 0x26c   :  { %v567_v58 = vadd.f32 %v1206_v40, %v558_v11 }
 0x26e   :  { %605 = vperm.xlu1 %877, %v567_v58   ;;  %v693_v58 = vperm.slane %v642_v37, 1 }
 0x272   :  { %575 = vperm.xlu0 %875, %v561_v0  }
 0x276   :  { %585 = vperm.xlu1 %877, %v563_v3  }
 0x2b2   :  { %v591_v6 = vpop.permute.xlu2 %590 }
 0x2b3   :  { %v612_v24 = vmul.f32 %v591_v6, %v1032_v39  ;;  %v30_v39 = vld [vmem:[%s1252_s0 + $0x44] sm:$0xf] }
 0x2ba   :  { %v581_v20 = vpop.permute.xlu2 %580 }
 0x2bb   :  { %v610_v59 = vmul.f32 %v581_v20, %v1022_v29  ;;  %v827_v29 = vld [vmem:[%s1253_s1 + $0x1c] sm:$0xff]  ;;  %s949_s1 = smov [#allocation2]  }
 0x2bc   :  { %660 = vmatpush.bf16.msrb.mxu3 %v827_v29  ;;  %s737_s24 = sshll.u32 %s949_s1, 4  ;;  %s738_s24 = int_to_ptr.vmem [resolvable:$true] %s737_s24 }
 0x2c2   :  { %v571_v61 = vpop.permute.xlu2 %570 }
 0x2d4   :  { %v596_v9 = vpop.permute.xlu1 %595 }
 0x2d5   :  { %v613_v23 = vmul.f32 %v596_v9, %v1039_v44 }
 0x2d7   :  { %v618_v12 = vpack.c.bf16 %v613_v23, %v612_v24 }
 0x2dc   :  { %v601_v13 = vpop.permute.xlu0 %600 }
 0x2dd   :  { %v614_v21 = vmul.f32 %v601_v13, %v1046_v54  ;;  %v948_v13 = vmov 1  }
 0x2de   :  { %878 = vset.pattern.permute.xlu0 %v948_v13 }
 0x2e0   :  { %v606_v53 = vpop.permute.xlu1 %605 }
 0x2e1   :  { %v615_v22 = vmul.f32 %v606_v53, %v1050_v57  ;;  %v608_v57 = vmul.f32 %v571_v61, %v1011_v15 }
 0x2e3   :  { %v619_v18 = vpack.c.bf16 %v615_v22, %v614_v21 }
 0x2e4   :  { %v576_v1 = vpop.permute.xlu0 %575 }
 0x2e5   :  { %627 = vmatpush.bf16.msrb.mxu2 %v619_v18  ;;  %v609_v27 = vmul.f32 %v576_v1, %v1015_v19 }
 0x2e7   :  { %v616_v44 = vpack.c.bf16 %v609_v27, %v608_v57 }
 0x2e8   :  { %v586_v26 = vpop.permute.xlu1 %585 }
 0x2e9   :  { %v611_v62 = vmul.f32 %v586_v26, %v1026_v32  ;;  %628 = vmatpush.bf16.msrb.mxu2 %v618_v12  ;;  %v173_v32 = vpop.f32.mrf.mxu3 }
 0x2ea   :  { %v174_v31 = vadd.f32 %v173_v32, %v1008_v14  ;;  %v666_v14 = vunpack.c.l.bf16 %v43_v63 }
 0x2eb   :  { %v617_v54 = vpack.c.bf16 %v611_v62, %v610_v59 }
 0x2ec   :  { %v667_v41 = vperm.slane %v666_v14, 3  ;;  %v691_v60 = vperm.slane %v666_v14, 2 }
 0x2ed   :  { %629 = vmatpush.bf16.msrb.mxu2 %v617_v54 }
 0x2f1   :  { %630 = vmatpush.bf16.msrb.mxu2 %v616_v44  ;;  %v175_v30 = vpop.f32.mrf.mxu3 }
 0x2f4   :  { %809 = vmatmul.msk.bf16.vlgmr.msrb.gmra.mxu2 %vm534_vm12, %v30_v39 }
 0x377   :  { %v632_v19 = vpop.f32.mrf.mxu2 }
 0x378   :  { %637 = vrot.lane.b32.xlu1 %v632_v19, %s945_s29 }
 0x37f   :  { %v634_v15 = vpop.f32.mrf.mxu2 }
 0x3ea   :  { %v638_v33 = vpop.permute.xlu1 %637 }
 0x3eb   :  { %v640_v34 = vsel %vm249_vm2, %v174_v31, %v638_v33 }
 0x3ec   :  { %v641_v35 = vpack.c.bf16 %v640_v34, %v640_v34 }
 0x3ee   :  { %814 = vmatmul.msk.bf16.vlgmr.msrb.gmra.mxu3 %vm96_vm0, %v641_v35 }
 0x471   :  { %v662_v42 = vpop.f32.mrf.mxu3 }
 0x472   :  { %v663_v43 = vadd.f32 %v662_v42, %v643_v38 }
 0x474   :  { %v668_v28 = vmul.f32 %v667_v41, %v663_v43 }
 0x476   :  { %v671_v48 = vadd.f32 %v670_v47, %v668_v28 }
 0x478   :  { %v815_v50 = vmul.f32 -1.442695, %v671_v48 }
 0x479   :  { %v664_v7 = vpop.f32.mrf.mxu3 }
 0x47a   :  { %911 = vpow2.f32 %v815_v50 }
 0x480   :  { %v912_v49 = vpop.eup %911 }
 0x481   :  { %v675_v45 = vadd.f32 1.0, %v912_v49 }
 0x483   :  { %913 = vrcp.f32 %v675_v45  ;;  %v687_v51 = vand.u32 2147483648, %v675_v45  ;;  %v685_v55 = vand.u32 2147483647, %v675_v45  ;;  %vm681_vm2 = vweird.f32 %v675_v45 }
 0x485   :  { %v688_v10 = vor.u32 1.1754944e-38, %v687_v51  ;;  %vm686_vm10 = vcmp.eq.f32.partialorder %v685_v55, 8.507059e+37 }
 0x489   :  { %v914_v46 = vpop.eup %913 }
 0x48a   :  { %v677_v17 = vmul.f32 %v914_v46, %v675_v45  ;;  %vm682_vm0 = vweird.f32 %v914_v46 }
 0x48b   :  { %vm683_vm12 = vmor %vm681_vm2, %vm682_vm0 }
 0x48c   :  { %v678_v16 = vsub.f32 1.0, %v677_v17 }
 0x48e   :  { %v679_v52 = vmul.f32 %v914_v46, %v678_v16 }
 0x490   :  { %v680_v56 = vadd.f32 %v914_v46, %v679_v52 }
 0x492   :  { %v684_v11 = vsel %vm683_vm12, %v914_v46, %v680_v56 }
 0x493   :  { %v689_v0 = vsel %vm686_vm10, %v688_v10, %v684_v11 }
 0x494   :  { %v692_v3 = vmul.f32 %v691_v60, %v689_v0 }
 0x496   :  { %v694_v4 = vadd.f32 %v693_v58, %v692_v3 }
 0x498   :  { %v695_v6 = vmul.f32 %v694_v4, %v663_v43 }
 0x49a   :  { %v697_v8 = vmul.f32 %v696_v5, %v695_v6 }
 0x49c   :  { %v699_v9 = vsel %vm698_vm11, %v697_v8, 0.0 }
 0x49d   :  { %700 = vadd.xlane.f32.xlu2 %v699_v9 }
 0x510   :  { %v701_v20 = vpop.xlane.xlu2 %700 }
 0x511   :  { %v702_v53 = vadd.f32 %v701_v20, %v1206_v40  ;;  %v726_v40 = vlaneseq }
 0x513   :  { %v816_v21 = vmul.f32 -1.442695, %v702_v53  ;;  %v727_v57 = vand.u32 127, %v726_v40 }
 0x515   :  { %915 = vpow2.f32 %v816_v21 }
 0x51b   :  { %v916_v22 = vpop.eup %915 }
 0x51c   :  { %v706_v23 = vadd.f32 1.0, %v916_v22 }
 0x51e   :  { %917 = vrcp.f32 %v706_v23  ;;  %v718_v1 = vand.u32 2147483648, %v706_v23  ;;  %v716_v59 = vand.u32 2147483647, %v706_v23  ;;  %vm712_vm14 = vweird.f32 %v706_v23 }
 0x520   :  { %v719_v61 = vor.u32 1.1754944e-38, %v718_v1  ;;  %vm717_vm1 = vcmp.eq.f32.partialorder %v716_v59, 8.507059e+37 }
 0x524   :  { %v918_v18 = vpop.eup %917 }
 0x525   :  { %v708_v24 = vmul.f32 %v918_v18, %v706_v23  ;;  %vm713_vm13 = vweird.f32 %v918_v18 }
 0x526   :  { %vm714_vm15 = vmor %vm712_vm14, %vm713_vm13 }
 0x527   :  { %v709_v12 = vsub.f32 1.0, %v708_v24 }
 0x529   :  { %v710_v26 = vmul.f32 %v918_v18, %v709_v12 }
 0x52b   :  { %v711_v62 = vadd.f32 %v918_v18, %v710_v26 }
 0x52d   :  { %v715_v27 = vsel %vm714_vm15, %v918_v18, %v711_v62 }
 0x52e   :  { %v720_v54 = vsel %vm717_vm1, %v719_v61, %v715_v27 }
 0x52f   :  { %724 = vperm.xlu0 %878, %v720_v54  }
 0x5a1   :  { %v725_v44 = vpop.permute.xlu0 %724 }
 0x5a2   :  { %v728_v39 = vperm.slane %v725_v44, %v727_v57 }
 0x5a4   :  { %731 = vst.msk [vmem:[#allocation2] sm:$0x1] %vm730_vm3, %v728_v39 }
 0x5a5   :  { %742 = dma.vmem_to_hbm [thread:$0]  %s738_s24, 16, %s740_s27, [#allocation3]  }
 0x5a6   :  { %943 = dma.done.wait [#allocation3], 16  }
 0x5a7   :  { %944 = vsyncadd [#allocation3], 4294967280 }
 0x5a8   :  { %747 = vsyncpa [#allocation3], 1 }

</bundles_post_ra>
